<compile_context>
chip_gen: v5e
topology: v5e:2x2
jax: 0.10.0
libtpu: 0.0.40
codegen_flags: <defaults>
</compile_context>

<pallas_src>
import functools

import jax
import jax.numpy as jnp
from jax.experimental import pallas as pl
from jax.experimental.pallas import tpu as pltpu


# ------------------------------------------------------------------ kernel --
def _pointnetfeat_kernel(x_ref, w1_ref, b1_ref, w2_ref, b2_ref,
                         w3_ref, b3_ref, o_ref, *, dim):
    j = pl.program_id(1)                                   # point-tile index
    x = x_ref[0].astype(jnp.float32)                       # (TN, dim)

    # conv1 (Cin = dim = 3): VPU rank-1 updates, skip the MXU entirely.
    w1 = w1_ref[...].astype(jnp.float32)                   # (dim, 64)
    h = x[:, 0:1] * w1[0:1, :]
    for c in range(1, dim):                                # dim is static (3)
        h = h + x[:, c:c + 1] * w1[c:c + 1, :]
    h1 = jnp.maximum(h + b1_ref[...], 0.0)                 # (TN, 64)

    # conv2: (TN, 64) @ (64, 128) + bias, ReLU.
    h2 = jnp.maximum(
        jnp.dot(h1, w2_ref[...], preferred_element_type=jnp.float32)
        + b2_ref[...], 0.0)                                # (TN, 128)

    # conv3: (TN, 128) @ (128, 512) + bias (no activation in the module).
    h3 = (jnp.dot(h2, w3_ref[...], preferred_element_type=jnp.float32)
          + b3_ref[...])                                   # (TN, 512)

    pm = jnp.max(h3, axis=0, keepdims=True)                # (1, 512)

    @pl.when(j == 0)
    def _():
        o_ref[0] = pm

    @pl.when(j > 0)
    def _():
        o_ref[0] = jnp.maximum(o_ref[0], pm)


# ----------------------------------------------------------------- wrapper --
def _round_up(v, m):
    return (v + m - 1) // m * m


@functools.partial(jax.jit, static_argnames=("tile_n",))
def pointnetfeat_forward(x_ncw, params, *, tile_n=256):
    """x_ncw: (B, dim, N) NCW like the PyTorch module. Returns (B, 512)."""
    b, dim, n = x_ncw.shape
    w1 = jnp.transpose(params["w1"])                       # (dim, 64)
    w2 = jnp.transpose(params["w2"])                       # (64, 128)
    w3 = jnp.transpose(params["w3"])                       # (128, bottleneck)
    b1 = params["b1"].reshape(1, -1)
    b2 = params["b2"].reshape(1, -1)
    b3 = params["b3"].reshape(1, -1)
    bneck = w3.shape[1]

    x = jnp.transpose(x_ncw, (0, 2, 1)).astype(jnp.float32)   # (B, N, dim)

    # Tile the point axis; pad with duplicates of the last point (max pool is
    # invariant to duplicated points, so no masking is required).
    tn = min(tile_n, _round_up(n, 8))
    n_pad = _round_up(n, tn)
    if n_pad != n:
        pad = jnp.broadcast_to(x[:, -1:, :], (b, n_pad - n, dim))
        x = jnp.concatenate([x, pad], axis=1)
    n_tiles = n_pad // tn

    out = pl.pallas_call(
        functools.partial(_pointnetfeat_kernel, dim=dim),
        out_shape=jax.ShapeDtypeStruct((b, 1, bneck), jnp.float32),
        grid=(b, n_tiles),
        in_specs=[
            pl.BlockSpec((1, tn, dim), lambda i, j: (i, j, 0)),
            pl.BlockSpec(w1.shape, lambda i, j: (0, 0)),
            pl.BlockSpec(b1.shape, lambda i, j: (0, 0)),
            pl.BlockSpec(w2.shape, lambda i, j: (0, 0)),
            pl.BlockSpec(b2.shape, lambda i, j: (0, 0)),
            pl.BlockSpec(w3.shape, lambda i, j: (0, 0)),
            pl.BlockSpec(b3.shape, lambda i, j: (0, 0)),
        ],
        out_specs=pl.BlockSpec((1, 1, bneck), lambda i, j: (i, 0, 0)),
        compiler_params=pltpu.CompilerParams(
            dimension_semantics=("parallel", "arbitrary")),
    )(x, w1, b1, w2, b2, w3, b3)
    return out[:, 0, :]                                    # (B, bottleneck)


# ------------------------------------------------------------------ params --
def init_params(key, dim=3, bottleneck_size=512):
    """PyTorch Conv1d-style init: U(-1/sqrt(fan_in), 1/sqrt(fan_in))."""
    ks = jax.random.split(key, 6)

    def u(kk, shape, fan_in):
        bound = 1.0 / jnp.sqrt(jnp.float32(fan_in))
        return jax.random.uniform(kk, shape, jnp.float32, -bound, bound)

    return dict(
        w1=u(ks[0], (64, dim), dim),            b1=u(ks[1], (64,), dim),
        w2=u(ks[2], (128, 64), 64),             b2=u(ks[3], (128,), 64),
        w3=u(ks[4], (bottleneck_size, 128), 128),
        b3=u(ks[5], (bottleneck_size,), 128),
    )


# -------------------------------------------------------------------- main --
if __name__ == "__main__":
    key = jax.random.PRNGKey(0)
    pkey, xkey = jax.random.split(key)
    params = init_params(pkey)

    B, DIM, N = 2, 3, 200        # N not a multiple of the tile -> pad path
    x = jax.random.normal(xkey, (B, DIM, N), jnp.float32)

    out = pointnetfeat_forward(x, params, tile_n=128)
    jax.block_until_ready(out)
    assert out.shape == (B, 512), out.shape
    assert bool(jnp.all(jnp.isfinite(out)))

    # Pure-JAX reference for correctness.
    xr = jnp.transpose(x, (0, 2, 1))
    h1 = jnp.maximum(xr @ params["w1"].T + params["b1"], 0.0)
    h2 = jnp.maximum(h1 @ params["w2"].T + params["b2"], 0.0)
    h3 = h2 @ params["w3"].T + params["b3"]
    ref = jnp.max(h3, axis=1)
    err = float(jnp.max(jnp.abs(out - ref)))
    assert jnp.allclose(out, ref, rtol=1e-4, atol=1e-4), err

    print("KERNEL_OK")
</pallas_src>

<mosaic_0001>
module attributes {stable_mosaic.version = 11 : i64} {
  func.func @_pointnetfeat_kernel(%arg0: i32, %arg1: i32, %arg2: memref<1x128x3xf32, #tpu.memory_space<vmem>>, %arg3: memref<3x64xf32, #tpu.memory_space<vmem>>, %arg4: memref<1x64xf32, #tpu.memory_space<vmem>>, %arg5: memref<64x128xf32, #tpu.memory_space<vmem>>, %arg6: memref<1x128xf32, #tpu.memory_space<vmem>>, %arg7: memref<128x512xf32, #tpu.memory_space<vmem>>, %arg8: memref<1x512xf32, #tpu.memory_space<vmem>>, %arg9: memref<1x1x512xf32, #tpu.memory_space<vmem>>) attributes {dimension_semantics = [#tpu.dimension_semantics<parallel>, #tpu.dimension_semantics<arbitrary>], iteration_bounds = array<i64: 2, 2>, scalar_prefetch = 0 : i64, scratch_operands = 0 : i64, tpu.core_type = #tpu.core_type<tc>, window_params = [{transform_indices = @transform_0, window_bounds = array<i64: 1, 128, 3>}, {pipeline_mode = #tpu.pipeline_mode<synchronous>, transform_indices = @transform_1, window_bounds = array<i64: 3, 64>}, {pipeline_mode = #tpu.pipeline_mode<synchronous>, transform_indices = @transform_2, window_bounds = array<i64: 1, 64>}, {pipeline_mode = #tpu.pipeline_mode<synchronous>, transform_indices = @transform_3, window_bounds = array<i64: 64, 128>}, {pipeline_mode = #tpu.pipeline_mode<synchronous>, transform_indices = @transform_4, window_bounds = array<i64: 1, 128>}, {pipeline_mode = #tpu.pipeline_mode<synchronous>, transform_indices = @transform_5, window_bounds = array<i64: 128, 512>}, {pipeline_mode = #tpu.pipeline_mode<synchronous>, transform_indices = @transform_6, window_bounds = array<i64: 1, 512>}, {transform_indices = @transform_7, window_bounds = array<i64: 1, 1, 512>}]} {
    %c0 = arith.constant 0 : index
    %c0_0 = arith.constant 0 : index
    %c0_1 = arith.constant 0 : index
    %0 = vector.load %arg2[%c0, %c0_0, %c0_1] : memref<1x128x3xf32, #tpu.memory_space<vmem>>, vector<1x128x3xf32>
    %1 = vector.shape_cast %0 : vector<1x128x3xf32> to vector<128x3xf32>
    %c0_2 = arith.constant 0 : index
    %c0_3 = arith.constant 0 : index
    %2 = vector.load %arg3[%c0_2, %c0_3] : memref<3x64xf32, #tpu.memory_space<vmem>>, vector<3x64xf32>
    %3 = vector.extract_strided_slice %1 {offsets = [0, 0], sizes = [128, 1], strides = [1, 1]} : vector<128x3xf32> to vector<128x1xf32>
    %4 = vector.extract_strided_slice %2 {offsets = [0, 0], sizes = [1, 64], strides = [1, 1]} : vector<3x64xf32> to vector<1x64xf32>
    %5 = vector.broadcast %3 : vector<128x1xf32> to vector<128x64xf32>
    %6 = vector.broadcast %4 : vector<1x64xf32> to vector<128x64xf32>
    %7 = arith.mulf %5, %6 : vector<128x64xf32>
    %8 = vector.extract_strided_slice %1 {offsets = [0, 1], sizes = [128, 1], strides = [1, 1]} : vector<128x3xf32> to vector<128x1xf32>
    %9 = vector.extract_strided_slice %2 {offsets = [1, 0], sizes = [1, 64], strides = [1, 1]} : vector<3x64xf32> to vector<1x64xf32>
    %10 = vector.broadcast %8 : vector<128x1xf32> to vector<128x64xf32>
    %11 = vector.broadcast %9 : vector<1x64xf32> to vector<128x64xf32>
    %12 = arith.mulf %10, %11 : vector<128x64xf32>
    %13 = arith.addf %7, %12 : vector<128x64xf32>
    %14 = vector.extract_strided_slice %1 {offsets = [0, 2], sizes = [128, 1], strides = [1, 1]} : vector<128x3xf32> to vector<128x1xf32>
    %15 = vector.extract_strided_slice %2 {offsets = [2, 0], sizes = [1, 64], strides = [1, 1]} : vector<3x64xf32> to vector<1x64xf32>
    %16 = vector.broadcast %14 : vector<128x1xf32> to vector<128x64xf32>
    %17 = vector.broadcast %15 : vector<1x64xf32> to vector<128x64xf32>
    %18 = arith.mulf %16, %17 : vector<128x64xf32>
    %19 = arith.addf %13, %18 : vector<128x64xf32>
    %c0_4 = arith.constant 0 : index
    %c0_5 = arith.constant 0 : index
    %20 = vector.load %arg4[%c0_4, %c0_5] : memref<1x64xf32, #tpu.memory_space<vmem>>, vector<1x64xf32>
    %21 = vector.broadcast %20 : vector<1x64xf32> to vector<128x64xf32>
    %22 = arith.addf %19, %21 : vector<128x64xf32>
    %cst = arith.constant 0.000000e+00 : f32
    %23 = vector.broadcast %cst : f32 to vector<128x64xf32>
    %24 = arith.maximumf %22, %23 : vector<128x64xf32>
    %c0_6 = arith.constant 0 : index
    %c0_7 = arith.constant 0 : index
    %25 = vector.load %arg5[%c0_6, %c0_7] : memref<64x128xf32, #tpu.memory_space<vmem>>, vector<64x128xf32>
    %cst_8 = arith.constant dense<0.000000e+00> : vector<128x128xf32>
    %26 = tpu.matmul %24, %25, %cst_8 {dimension_numbers = #tpu.dot_dimension_numbers<[1], [0], [0], [1], [0, 0, 1, 1], [], []>} : vector<128x64xf32>, vector<64x128xf32>, vector<128x128xf32> -> vector<128x128xf32>
    %c0_9 = arith.constant 0 : index
    %c0_10 = arith.constant 0 : index
    %27 = vector.load %arg6[%c0_9, %c0_10] : memref<1x128xf32, #tpu.memory_space<vmem>>, vector<1x128xf32>
    %28 = vector.broadcast %27 : vector<1x128xf32> to vector<128x128xf32>
    %29 = arith.addf %26, %28 : vector<128x128xf32>
    %cst_11 = arith.constant 0.000000e+00 : f32
    %30 = vector.broadcast %cst_11 : f32 to vector<128x128xf32>
    %31 = arith.maximumf %29, %30 : vector<128x128xf32>
    %c0_12 = arith.constant 0 : index
    %c0_13 = arith.constant 0 : index
    %32 = vector.load %arg7[%c0_12, %c0_13] : memref<128x512xf32, #tpu.memory_space<vmem>>, vector<128x512xf32>
    %cst_14 = arith.constant dense<0.000000e+00> : vector<128x512xf32>
    %33 = tpu.matmul %31, %32, %cst_14 {dimension_numbers = #tpu.dot_dimension_numbers<[1], [0], [0], [1], [0, 0, 1, 1], [], []>} : vector<128x128xf32>, vector<128x512xf32>, vector<128x512xf32> -> vector<128x512xf32>
    %c0_15 = arith.constant 0 : index
    %c0_16 = arith.constant 0 : index
    %34 = vector.load %arg8[%c0_15, %c0_16] : memref<1x512xf32, #tpu.memory_space<vmem>>, vector<1x512xf32>
    %35 = vector.broadcast %34 : vector<1x512xf32> to vector<128x512xf32>
    %36 = arith.addf %33, %35 : vector<128x512xf32>
    %cst_17 = arith.constant dense<0xFF800000> : vector<512xf32>
    %37 = vector.multi_reduction <maximumf>, %36, %cst_17 [0] : vector<128x512xf32> to vector<512xf32>
    %38 = vector.shape_cast %37 : vector<512xf32> to vector<1x512xf32>
    %c0_i32 = arith.constant 0 : i32
    %39 = arith.cmpi eq, %arg1, %c0_i32 : i32
    %40 = arith.extui %39 : i1 to i32
    %c0_i32_18 = arith.constant 0 : i32
    %41 = arith.cmpi ne, %40, %c0_i32_18 : i32
    scf.if %41 {
      %c0_21 = arith.constant 0 : index
      %c0_22 = arith.constant 0 : index
      %c0_23 = arith.constant 0 : index
      %45 = vector.load %arg9[%c0_21, %c0_22, %c0_23] : memref<1x1x512xf32, #tpu.memory_space<vmem>>, vector<1x1x512xf32>
      %46 = vector.shape_cast %45 : vector<1x1x512xf32> to vector<1x512xf32>
      %47 = vector.shape_cast %38 : vector<1x512xf32> to vector<1x1x512xf32>
      tpu.vector_store %arg9[%c0_21, %c0_22, %c0_23], %47 {strides = array<i32>} : memref<1x1x512xf32, #tpu.memory_space<vmem>>, vector<1x1x512xf32>,
    } else {
    }
    %c0_i32_19 = arith.constant 0 : i32
    %42 = arith.cmpi sgt, %arg1, %c0_i32_19 : i32
    %43 = arith.extui %42 : i1 to i32
    %c0_i32_20 = arith.constant 0 : i32
    %44 = arith.cmpi ne, %43, %c0_i32_20 : i32
    scf.if %44 {
      %c0_21 = arith.constant 0 : index
      %c0_22 = arith.constant 0 : index
      %c0_23 = arith.constant 0 : index
      %45 = vector.load %arg9[%c0_21, %c0_22, %c0_23] : memref<1x1x512xf32, #tpu.memory_space<vmem>>, vector<1x1x512xf32>
      %46 = vector.shape_cast %45 : vector<1x1x512xf32> to vector<1x512xf32>
      %47 = arith.maximumf %46, %38 : vector<1x512xf32>
      %c0_24 = arith.constant 0 : index
      %c0_25 = arith.constant 0 : index
      %c0_26 = arith.constant 0 : index
      %48 = vector.load %arg9[%c0_24, %c0_25, %c0_26] : memref<1x1x512xf32, #tpu.memory_space<vmem>>, vector<1x1x512xf32>
      %49 = vector.shape_cast %48 : vector<1x1x512xf32> to vector<1x512xf32>
      %50 = vector.shape_cast %47 : vector<1x512xf32> to vector<1x1x512xf32>
      tpu.vector_store %arg9[%c0_24, %c0_25, %c0_26], %50 {strides = array<i32>} : memref<1x1x512xf32, #tpu.memory_space<vmem>>, vector<1x1x512xf32>,
    } else {
    }
    return
  }
  func.func @transform_0(%arg0: i32, %arg1: i32) -> (i32, i32, i32) {
    %c0_i32 = arith.constant 0 : i32
    %c0_i32_0 = arith.constant 0 : i32
    return %arg0, %arg1, %c0_i32 : i32, i32, i32
  }
  func.func @transform_1(%arg0: i32, %arg1: i32) -> (i32, i32) {
    %c0_i32 = arith.constant 0 : i32
    %c0_i32_0 = arith.constant 0 : i32
    %c0_i32_1 = arith.constant 0 : i32
    return %c0_i32, %c0_i32_0 : i32, i32
  }
  func.func @transform_2(%arg0: i32, %arg1: i32) -> (i32, i32) {
    %c0_i32 = arith.constant 0 : i32
    %c0_i32_0 = arith.constant 0 : i32
    %c0_i32_1 = arith.constant 0 : i32
    return %c0_i32, %c0_i32_0 : i32, i32
  }
  func.func @transform_3(%arg0: i32, %arg1: i32) -> (i32, i32) {
    %c0_i32 = arith.constant 0 : i32
    %c0_i32_0 = arith.constant 0 : i32
    %c0_i32_1 = arith.constant 0 : i32
    return %c0_i32, %c0_i32_0 : i32, i32
  }
  func.func @transform_4(%arg0: i32, %arg1: i32) -> (i32, i32) {
    %c0_i32 = arith.constant 0 : i32
    %c0_i32_0 = arith.constant 0 : i32
    %c0_i32_1 = arith.constant 0 : i32
    return %c0_i32, %c0_i32_0 : i32, i32
  }
  func.func @transform_5(%arg0: i32, %arg1: i32) -> (i32, i32) {
    %c0_i32 = arith.constant 0 : i32
    %c0_i32_0 = arith.constant 0 : i32
    %c0_i32_1 = arith.constant 0 : i32
    return %c0_i32, %c0_i32_0 : i32, i32
  }
  func.func @transform_6(%arg0: i32, %arg1: i32) -> (i32, i32) {
    %c0_i32 = arith.constant 0 : i32
    %c0_i32_0 = arith.constant 0 : i32
    %c0_i32_1 = arith.constant 0 : i32
    return %c0_i32, %c0_i32_0 : i32, i32
  }
  func.func @transform_7(%arg0: i32, %arg1: i32) -> (i32, i32, i32) {
    %c0_i32 = arith.constant 0 : i32
    %c0_i32_0 = arith.constant 0 : i32
    %c0_i32_1 = arith.constant 0 : i32
    return %arg0, %c0_i32, %c0_i32_0 : i32, i32, i32
  }
}

</mosaic_0001>

<bundles_post_ra>
// kernel: pointnetfeat_forward.1
= control target key start
LH: loop header
LB: loop body
LE: loop exit
PB: predicated region body
PF: predicated region fallthrough
CT: control target
= control target key end

     0   :  { %s1543_s24 = smov 0   ;;  %s1545_s25 = smov 0   ;;  %s2108_s0 = inlined_call_operand.vmem [shape: f32[2,256,3], index: 0, kind: input, shape index: {}]   ;;  %s2109_s1 = inlined_call_operand.vmem [shape: f32[3,64], index: 1, kind: input, shape index: {}]   ;;  %s2110_s2 = inlined_call_operand.vmem [shape: f32[1,64], index: 2, kind: input, shape index: {}]   ;;  %s2111_s3 = inlined_call_operand.vmem [shape: f32[64,128], index: 3, kind: input, shape index: {}]   ;;  %s2112_s4 = inlined_call_operand.vmem [shape: f32[1,128], index: 4, kind: input, shape index: {}]   ;;  %s2113_s5 = inlined_call_operand.vmem [shape: f32[128,512], index: 5, kind: input, shape index: {}]   ;;  %s2114_s6 = inlined_call_operand.vmem [shape: f32[1,512], index: 6, kind: input, shape index: {}]   ;;  %s2115_s7 = inlined_call_operand.vmem [shape: f32[2,1,512], index: 7, kind: output, shape index: {}]  }
   0x1   :  { %s1547_s26 = smov 0   ;;  %s1549_s27 = smov 0  }
   0x2   :  { %s1551_s28 = smov 0  }
   0x3 LB: > { %s26_s29 = sadd.s32 1, %s1490_s26  ;;  %s29_s30 = sadd.s32 1, %s1494_s27  ;;  %s1498_s28 = sphi %s1551_s28, %s17_s28   ;;  %s1494_s27 = sphi %s1549_s27, %s2119_s27   ;;  %s1490_s26 = sphi %s1547_s26, %s2118_s26   ;;  %s1486_s25 = sphi %s1545_s25, %s2117_s25   ;;  %s1482_s24 = sphi %s1543_s24, %s2116_s24  }
   0x4   : > { %p27_p0 = scmp.ge.s32.totalorder %s26_s29, 2  ;;  %p1331_p1 = scmp.ge.s32.totalorder %s1498_s28, 1 }
   0x5   : > { %p256_p2 = scmp.lt.s32.totalorder %s1498_s28, 5 }
   0x6   : > { %s2121_s29 = smov (%p27_p0, %s26_s29), 0  ;;  %s2123_s30 = smov (!%p27_p0, %s29_s30), %s1494_s27 }
   0x7   : > { %p257_p3 = pnand %p1331_p1, %p256_p2  ;;  %p31_p4 = scmp.ge.s32.totalorder %s2123_s30, 2 }
   0x8   : > { %s1332_s8 = sshll.u32 (!%p257_p3), %s1482_s24, 4  ;;  %p292_p5 = scmp.lt.s32.totalorder (!%p257_p3), %s1486_s25, 1 }
   0x9   : > { %s2125_s30 = smov (%p31_p4, %s2123_s30), 0  ;;  %260 = sbr.rel (%p257_p3) target bundleno = 604 (0x25c), region = 48 }
   0xa   : > { %p294_p6 = scmp.lt.s32.totalorder (!%p257_p3), %s1332_s8, 31  ;;  %p1352_p7 = scmp.ne.s32.totalorder (!%p257_p3), %s1482_s24, 0 }
   0xe   : > { %v1500_v0 = vmov 2   ;;  %v1501_v1 = vmov 0   ;;  %s2127_s25 = smov (!%p292_p5, %s1486_s25), 1  ;;  %v1502_v2 = vmov 1   ;;  %s2129_s8 = smov (!%p294_p6, %s1332_s8), 31  ;;  %v656_v14 = vld [vmem:[%s2111_s3 + $0x38] sm:$0xff] }
   0xf   : > { %1425 = vset.pattern.permute.xlu1 %v1500_v0  ;;  %1423 = vset.pattern.permute.xlu0 %v1501_v1  ;;  %s1333_s9 = sshll.u32 %s2127_s25, 5  ;;  %s1335_s10 = sshll.u32 %s2127_s25, 2  ;;  %v655_v15 = vld [vmem:[%s2111_s3 + $0x30] sm:$0xff]  ;;  %v654_v17 = vld [vmem:[%s2111_s3 + $0x28] sm:$0xff]  ;;  %v653_v20 = vld [vmem:[%s2111_s3 + $0x20] sm:$0xff]  ;;  %vm661_vm0 = vcmask 523264  }
  0x10   : > { %1427 = vset.pattern.permute.xlu2 %v1502_v2  ;;  %s297_s11 = sadd.s32 %s1333_s9, %s2129_s8  ;;  %s1582_s14 = scalar_lea.vmem %s2115_s7, %s1335_s10  ;;  %718 = vmatpush.msra.mxu0 %v656_v14  ;;  %v652_v21 = vld [vmem:[%s2111_s3 + $0x18] sm:$0xff]  ;;  %v651_v22 = vld [vmem:[%s2111_s3 + $0x10] sm:$0xff]  ;;  %v650_v23 = vld [vmem:[%s2111_s3 + $0x8] sm:$0xff] }
  0x11   : > { %s1334_s15 = sshll.u32 %s297_s11, 3  ;;  %1356 = vmatpush.msra.mxu1 %v656_v14  ;;  %1357 = vmatpush.msra.mxu2 %v656_v14  ;;  %v649_v24 = vld [vmem:[%s2111_s3] sm:$0xff] }
  0x12   : > { %s1587_s18 = scalar_lea.vmem %s2108_s0, %s1334_s15  ;;  %1358 = vmatpush.msra.mxu3 %v656_v14  ;;  %719 = vmatpush.msra.mxu0 %v655_v15  ;;  %v321_v30 = vld [vmem:[%s2109_s1] sm:$0x7] }
  0x13   : > { %v305_v3 = vld [vmem:[%s1587_s18] sm:$0xff]  ;;  %v306_v4 = vld [vmem:[%s1587_s18 + $0x8] sm:$0xff]  ;;  %v307_v5 = vld [vmem:[%s1587_s18 + $0x10] sm:$0xff]  ;;  %1359 = vmatpush.msra.mxu1 %v655_v15  ;;  %1360 = vmatpush.msra.mxu2 %v655_v15  ;;  %v1671_v31 = vperm.slane %v321_v30, 0  ;;  %v1675_v33 = vperm.slane %v321_v30, 1  ;;  %v1677_v34 = vperm.slane %v321_v30, 2 }
  0x14   : > { %517 = vperm.xlu1 %1425, %v305_v3   ;;  %324 = vperm.xlu0 %1423, %v305_v3   ;;  %v308_v6 = vld [vmem:[%s1587_s18 + $0x18] sm:$0xff]  ;;  %v309_v7 = vld [vmem:[%s1587_s18 + $0x20] sm:$0xff]  ;;  %v311_v8 = vld [vmem:[%s1587_s18 + $0x30] sm:$0xff] }
  0x15   : > { %424 = vperm.xlu2 %1427, %v306_v4   ;;  %v310_v9 = vld [vmem:[%s1587_s18 + $0x28] sm:$0xff]  ;;  %v312_v10 = vld [vmem:[%s1587_s18 + $0x38] sm:$0xff]  ;;  %v313_v12 = vld [vmem:[%s1587_s18 + $0x40] sm:$0xff]  ;;  %720 = vmatpush.msra.mxu0 %v654_v17 }
  0x16   : > { %v1611_v11 = vld [vmem:[%s1587_s18 + $0x48] sm:$0xff]  ;;  %v1619_v13 = vld [vmem:[%s1587_s18 + $0x58] sm:$0xff]  ;;  %v1632_v16 = vld [vmem:[%s1587_s18 + $0x60] sm:$0xff]  ;;  %1361 = vmatpush.msra.mxu3 %v655_v15  ;;  %1362 = vmatpush.msra.mxu1 %v654_v17 }
  0x17   : > { %v315_v18 = vld [vmem:[%s1587_s18 + $0x50] sm:$0xff]  ;;  %1363 = vmatpush.msra.mxu2 %v654_v17  ;;  %721 = vmatpush.msra.mxu0 %v653_v20  ;;  %v318_v43 = vld [vmem:[%s1587_s18 + $0x68] sm:$0xff]  ;;  %v1691_v44 = vld [vmem:[%s2110_s2] ss:$0 sm:$0xff] }
  0x18   : > { %1365 = vmatpush.msra.mxu1 %v653_v20  ;;  %1364 = vmatpush.msra.mxu3 %v654_v17  ;;  %v319_v26 = vld [vmem:[%s1587_s18 + $0x70] sm:$0xff] }
  0x19   : > { %722 = vmatpush.msra.mxu0 %v652_v21  ;;  %1366 = vmatpush.msra.mxu2 %v653_v20 }
  0x1a   : > { %1368 = vmatpush.msra.mxu1 %v652_v21  ;;  %1367 = vmatpush.msra.mxu3 %v653_v20 }
  0x1b   : > { %723 = vmatpush.msra.mxu0 %v651_v22  ;;  %1369 = vmatpush.msra.mxu2 %v652_v21 }
  0x1c   : > { %1426 = vset.pattern.permute.xlu1 %v1501_v1  ;;  %1424 = vset.pattern.permute.xlu0 %v1502_v2 }
  0x1d   : > { %329 = vperm.xlu1 %1426, %v306_v4   ;;  %420 = vperm.xlu0 %1424, %v305_v3  }
  0x1e   : > { %1428 = vset.pattern.permute.xlu2 %v1500_v0  ;;  %1371 = vmatpush.msra.mxu1 %v651_v22 }
  0x1f   : > { %521 = vperm.xlu2 %1428, %v306_v4   ;;  %724 = vmatpush.msra.mxu0 %v650_v23 }
  0x20   : > { %1374 = vmatpush.msra.mxu1 %v650_v23  ;;  %1372 = vmatpush.msra.mxu2 %v651_v22 }
  0x21   : > { %725 = vmatpush.msra.mxu0 %v649_v24  ;;  %1370 = vmatpush.msra.mxu3 %v652_v21 }
  0x22   : > { %1377 = vmatpush.msra.mxu1 %v649_v24  ;;  %1375 = vmatpush.msra.mxu2 %v650_v23 }
  0x23   : > { %1373 = vmatpush.msra.mxu3 %v651_v22 }
  0x24   : > { %1378 = vmatpush.msra.mxu2 %v649_v24 }
  0x25   : > { %334 = vperm.xlu1 %1426, %v307_v5   ;;  %1430 = vset.pattern.permute.xlu0 %v1500_v0 }
  0x26   : > { %525 = vperm.xlu0 %1430, %v307_v5   ;;  %1376 = vmatpush.msra.mxu3 %v650_v23 }
  0x27   : > { %1429 = vset.pattern.permute.xlu2 %v1502_v2 }
  0x28   : > { %428 = vperm.xlu2 %1429, %v307_v5   ;;  %1379 = vmatpush.msra.mxu3 %v649_v24 }
  0x2d   : > { %339 = vperm.xlu1 %1426, %v308_v6  }
  0x2e   : > { %1433 = vset.pattern.permute.xlu0 %v1502_v2 }
  0x2f   : > { %436 = vperm.xlu0 %1433, %v309_v7  }
  0x30   : > { %432 = vperm.xlu2 %1429, %v308_v6  }
  0x35   : > { %1431 = vset.pattern.permute.xlu1 %v1500_v0 }
  0x36   : > { %529 = vperm.xlu1 %1431, %v308_v6   ;;  %v320_v6 = vld [vmem:[%s1587_s18 + $0x78] sm:$0xff] }
  0x37   : > { %1436 = vset.pattern.permute.xlu0 %v1501_v1 }
  0x38   : > { %1432 = vset.pattern.permute.xlu2 %v1501_v1  ;;  %354 = vperm.xlu0 %1436, %v311_v8  }
  0x39   : > { %344 = vperm.xlu2 %1432, %v309_v7  }
  0x3e   : > { %533 = vperm.xlu1 %1431, %v309_v7  }
  0x40   : > { %1439 = vset.pattern.permute.xlu0 %v1500_v0 }
  0x41   : > { %349 = vperm.xlu2 %1432, %v310_v9   ;;  %545 = vperm.xlu0 %1439, %v312_v10  }
  0x46   : > { %1434 = vset.pattern.permute.xlu1 %v1502_v2 }
  0x47   : > { %440 = vperm.xlu1 %1434, %v310_v9  }
  0x49   : > { %1435 = vset.pattern.permute.xlu2 %v1500_v0  ;;  %1442 = vset.pattern.permute.xlu0 %v1502_v2 }
  0x4a   : > { %537 = vperm.xlu2 %1435, %v310_v9   ;;  %456 = vperm.xlu0 %1442, %v1611_v11  }
  0x4f   : > { %444 = vperm.xlu1 %1434, %v311_v8  }
  0x52   : > { %541 = vperm.xlu2 %1435, %v311_v8   ;;  %1447 = vset.pattern.permute.xlu0 %v1501_v1 }
  0x53   : > { %379 = vperm.xlu0 %1447, %v1619_v13  }
  0x57   : > { %1437 = vset.pattern.permute.xlu1 %v1501_v1 }
  0x58   : > { %359 = vperm.xlu1 %1437, %v312_v10  }
  0x5a   : > { %1438 = vset.pattern.permute.xlu2 %v1502_v2 }
  0x5b   : > { %448 = vperm.xlu2 %1438, %v312_v10   ;;  %1451 = vset.pattern.permute.xlu0 %v1500_v0 }
  0x5c   : > { %565 = vperm.xlu0 %1451, %v1632_v16  }
  0x60   : > { %364 = vperm.xlu1 %1437, %v313_v12  }
  0x63   : > { %452 = vperm.xlu2 %1438, %v313_v12  }
  0x64   : > { %1454 = vset.pattern.permute.xlu0 %v1502_v2 }
  0x65   : > { %476 = vperm.xlu0 %1454, %v319_v26  }
  0x68   : > { %1440 = vset.pattern.permute.xlu1 %v1500_v0 }
  0x69   : > { %549 = vperm.xlu1 %1440, %v313_v12  }
  0x6b   : > { %1441 = vset.pattern.permute.xlu2 %v1501_v1 }
  0x6c   : > { %369 = vperm.xlu2 %1441, %v1611_v11  }
  0x6d   : > { %1457 = vset.pattern.permute.xlu0 %v1500_v0 }
  0x6f   : > { %v1640_v19 = vpop.permute.xlu2 %424 }
  0x70   : > { %v485_v40 = vmul.f32 %v1675_v33, %v1640_v19 }
  0x71   : > { %1443 = vset.pattern.permute.xlu1 %v1501_v1 }
  0x72   : > { %374 = vperm.xlu1 %1443, %v315_v18  }
  0x74   : > { %1444 = vset.pattern.permute.xlu2 %v1502_v2 }
  0x75   : > { %460 = vperm.xlu2 %1444, %v315_v18  }
  0x79   : > { %v522_v25 = vpop.permute.xlu2 %521 }
  0x7a   : > { %1445 = vset.pattern.permute.xlu1 %v1500_v0  ;;  %v582_v46 = vmul.f32 %v1677_v34, %v522_v25 }
  0x7b   : > { %553 = vperm.xlu1 %1445, %v1611_v11  }
  0x7d   : > { %1446 = vset.pattern.permute.xlu2 %v1500_v0 }
  0x7e   : > { %557 = vperm.xlu2 %1446, %v315_v18  }
  0x82   : > { %v429_v27 = vpop.permute.xlu2 %428 }
  0x83   : > { %1448 = vset.pattern.permute.xlu1 %v1502_v2  ;;  %v486_v52 = vmul.f32 %v1675_v33, %v429_v27 }
  0x84   : > { %464 = vperm.xlu1 %1448, %v1619_v13  }
  0x86   : > { %v518_v28 = vpop.permute.xlu1 %517  ;;  %v325_v29 = vpop.permute.xlu0 %324  ;;  %561 = vperm.xlu2 %1446, %v1619_v13  }
  0x87   : > { %v403_v35 = vmul.f32 %v1671_v31, %v325_v29  ;;  %v581_v41 = vmul.f32 %v1677_v34, %v518_v28 }
  0x8a   : > { %v433_v32 = vpop.permute.xlu2 %432 }
  0x8b   : > { %v487_v5 = vmul.f32 %v1675_v33, %v433_v32 }
  0x8c   : > { %1449 = vset.pattern.permute.xlu1 %v1501_v1 }
  0x8d   : > { %384 = vperm.xlu1 %1449, %v1632_v16  }
  0x8e   : > { %1450 = vset.pattern.permute.xlu2 %v1502_v2 }
  0x8f   : > { %v330_v36 = vpop.permute.xlu1 %329  ;;  %v421_v37 = vpop.permute.xlu0 %420  ;;  %468 = vperm.xlu2 %1450, %v1632_v16  }
  0x90   : > { %v404_v38 = vmul.f32 %v1671_v31, %v330_v36  ;;  %v484_v39 = vmul.f32 %v1675_v33, %v421_v37 }
  0x92   : > { %v500_v42 = vadd.f32 %v484_v39, %v403_v35  ;;  %v501_v47 = vadd.f32 %v485_v40, %v404_v38 }
  0x93   : > { %v345_v45 = vpop.permute.xlu2 %344 }
  0x94   : > { %v597_v48 = vadd.f32 %v581_v41, %v500_v42  ;;  %v598_v51 = vadd.f32 %v582_v46, %v501_v47  ;;  %v407_v12 = vmul.f32 %v1671_v31, %v345_v45 }
  0x95   : > { %389 = vperm.xlu1 %1449, %v318_v43  }
  0x96   : > { %v617_v49 = vadd.f32 %v1691_v44, %v597_v48  ;;  %v618_v58 = vadd.f32 %v1691_v44, %v598_v51 }
  0x97   : > { %v335_v50 = vpop.permute.xlu1 %334  ;;  %472 = vperm.xlu2 %1450, %v318_v43  }
  0x98   : > { %v405_v53 = vmul.f32 %v1671_v31, %v335_v50  ;;  %v633_v54 = vmax.f32 %v617_v49, 0.0  ;;  %v526_v55 = vpop.permute.xlu0 %525  ;;  %v634_v62 = vmax.f32 %v618_v58, 0.0 }
  0x99   : > { %v583_v57 = vmul.f32 %v1677_v34, %v526_v55 }
  0x9a   : > { %1336 = vmatmul.msk.f32.vlgmr.msra.gmra.mxu0 %vm661_vm0, %v633_v54  ;;  %v502_v56 = vadd.f32 %v486_v52, %v405_v53 }
  0x9b   : > { %v350_v59 = vpop.permute.xlu2 %349 }
  0x9c   : > { %v599_v61 = vadd.f32 %v583_v57, %v502_v56  ;;  %v408_v24 = vmul.f32 %v1671_v31, %v350_v59  ;;  %v851_v59 = vld [vmem:[%s2113_s5 + $0x1e0] sm:$0xff] }
  0x9d   : > { %1452 = vset.pattern.permute.xlu1 %v1500_v0  ;;  %865 = vmatpush.msrb.mxu1 %v851_v59 }
  0x9e   : > { %569 = vperm.xlu1 %1452, %v318_v43   ;;  %v619_v63 = vadd.f32 %v1691_v44, %v599_v61  ;;  %v847_v61 = vld [vmem:[%s2113_s5 + $0x1c0] sm:$0xff] }
  0x9f   : > { %v340_v60 = vpop.permute.xlu1 %339  ;;  %1453 = vset.pattern.permute.xlu2 %v1501_v1  ;;  %866 = vmatpush.msrb.mxu1 %v847_v61  ;;  %v812_v61 = vld [vmem:[%s2113_s5 + $0xa8] sm:$0xff] }
  0xa0   : > { %394 = vperm.xlu2 %1453, %v319_v26   ;;  %v406_v3 = vmul.f32 %v1671_v31, %v340_v60  ;;  %v635_v8 = vmax.f32 %v619_v63, 0.0  ;;  %v854_v60 = vld [vmem:[%s2113_s5 + $0x1f8] sm:$0xff] }
  0xa1   : > { %v437_v10 = vpop.permute.xlu0 %436  ;;  %1060 = vmatpush.msrb.mxu0 %v854_v60  ;;  %v806_v60 = vld [vmem:[%s2113_s5 + $0x78] sm:$0xff] }
  0xa2   : > { %1337 = vmatmul.msk.f32.gmra.mxu0 %vm661_vm0, %v634_v62  ;;  %v503_v9 = vadd.f32 %v487_v5, %v406_v3  ;;  %v488_v13 = vmul.f32 %v1675_v33, %v437_v10  ;;  %v850_v3 = vld [vmem:[%s2113_s5 + $0x1d8] sm:$0xff]  ;;  %v839_v10 = vld [vmem:[%s2113_s5 + $0x180] sm:$0xff] }
  0xa3   : > { %1061 = vmatpush.msrb.mxu0 %v850_v3  ;;  %v799_v3 = vld [vmem:[%s2113_s5 + $0x40] sm:$0xff] }
  0xa4   : > { %v538_v4 = vpop.permute.xlu2 %537  ;;  %v504_v18 = vadd.f32 %v488_v13, %v407_v12  ;;  %v848_v13 = vld [vmem:[%s2113_s5 + $0x1c8] sm:$0xff] }
  0xa6   : > { %573 = vperm.xlu1 %1452, %v319_v26  }
  0xa8   : > { %v530_v7 = vpop.permute.xlu1 %529  ;;  %399 = vperm.xlu2 %1453, %v320_v6  }
  0xa9   : > { %v584_v1 = vmul.f32 %v1677_v34, %v530_v7  ;;  %v846_v7 = vld [vmem:[%s2113_s5 + $0x1b8] sm:$0xff] }
  0xaa   : > { %1338 = vmatmul.msk.f32.gmra.mxu0 %vm661_vm0, %v635_v8  ;;  %v355_v27 = vpop.permute.xlu0 %354  ;;  %v852_v8 = vld [vmem:[%s2113_s5 + $0x1e8] sm:$0xff] }
  0xab   : > { %v600_v11 = vadd.f32 %v584_v1, %v503_v9  ;;  %v409_v29 = vmul.f32 %v1671_v31, %v355_v27  ;;  %1062 = vmatpush.msrb.mxu0 %v846_v7  ;;  %930 = vmatpush.msrb.mxu2 %v852_v8  ;;  %v808_v7 = vld [vmem:[%s2113_s5 + $0x88] sm:$0xff]  ;;  %v795_v8 = vld [vmem:[%s2113_s5 + $0x20] sm:$0xff] }
  0xac   : > { %v542_v17 = vpop.permute.xlu2 %541 }
  0xad   : > { %v620_v14 = vadd.f32 %v1691_v44, %v600_v11  ;;  %v587_v37 = vmul.f32 %v1677_v34, %v542_v17  ;;  %v842_v11 = vld [vmem:[%s2113_s5 + $0x198] sm:$0xff]  ;;  %931 = vmatpush.msrb.mxu2 %v848_v13  ;;  %v844_v17 = vld [vmem:[%s2113_s5 + $0x1a8] sm:$0xff] }
  0xae   : > { %1455 = vset.pattern.permute.xlu1 %v1502_v2  ;;  %v586_v2 = vmul.f32 %v1677_v34, %v538_v4  ;;  %1063 = vmatpush.msrb.mxu0 %v842_v11  ;;  %v804_v13 = vld [vmem:[%s2113_s5 + $0x68] sm:$0xff] }
  0xaf   : > { %480 = vperm.xlu1 %1455, %v320_v6   ;;  %v636_v15 = vmax.f32 %v620_v14, 0.0  ;;  %932 = vmatpush.msrb.mxu2 %v844_v17 }
  0xb0   : > { %v534_v16 = vpop.permute.xlu1 %533  ;;  %1456 = vset.pattern.permute.xlu2 %v1500_v0 }
  0xb1   : > { %v585_v19 = vmul.f32 %v1677_v34, %v534_v16  ;;  %577 = vperm.xlu2 %1456, %v320_v6   ;;  %v843_v6 = vld [vmem:[%s2113_s5 + $0x1a0] sm:$0xff]  ;;  %v838_v16 = vld [vmem:[%s2113_s5 + $0x178] sm:$0xff] }
  0xb2   : > { %1339 = vmatmul.msk.f32.gmra.mxu0 %vm661_vm0, %v636_v15  ;;  %867 = vmatpush.msrb.mxu1 %v843_v6  ;;  %v835_v15 = vld [vmem:[%s2113_s5 + $0x160] sm:$0xff] }
  0xb3   : > { %v601_v20 = vadd.f32 %v585_v19, %v504_v18  ;;  %v546_v42 = vpop.permute.xlu0 %545  ;;  %1064 = vmatpush.msrb.mxu0 %v838_v16  ;;  %v794_v16 = vld [vmem:[%s2113_s5 + $0x18] sm:$0xff] }
  0xb4   : > { %v588_v48 = vmul.f32 %v1677_v34, %v546_v42  ;;  %868 = vmatpush.msrb.mxu1 %v839_v10  ;;  %v818_v42 = vld [vmem:[%s2113_s5 + $0xd8] sm:$0xff] }
  0xb5   : > { %v621_v21 = vadd.f32 %v1691_v44, %v601_v20  ;;  %v449_v0 = vpop.permute.xlu2 %448  ;;  %v831_v20 = vld [vmem:[%s2113_s5 + $0x140] sm:$0xff] }
  0xb6   : > { %v491_v43 = vmul.f32 %v1675_v33, %v449_v0  ;;  %869 = vmatpush.msrb.mxu1 %v835_v15  ;;  %v841_v15 = vld [vmem:[%s2113_s5 + $0x190] sm:$0xff] }
  0xb7   : > { %v637_v22 = vmax.f32 %v621_v21, 0.0  ;;  %v834_v21 = vld [vmem:[%s2113_s5 + $0x158] sm:$0xff] }
  0xb8   : > { %870 = vmatpush.msrb.mxu1 %v831_v20  ;;  %1065 = vmatpush.msrb.mxu0 %v834_v21  ;;  %v796_v20 = vld [vmem:[%s2113_s5 + $0x28] sm:$0xff] }
  0xb9   : > { %v441_v23 = vpop.permute.xlu1 %440 }
  0xba   : > { %v489_v25 = vmul.f32 %v1675_v33, %v441_v23  ;;  %1340 = vmatmul.msk.f32.gmra.mxu0 %vm661_vm0, %v637_v22 }
  0xbc   : > { %v505_v26 = vadd.f32 %v489_v25, %v408_v24  ;;  %v457_v22 = vpop.permute.xlu0 %456  ;;  %v840_v24 = vld [vmem:[%s2113_s5 + $0x188] sm:$0xff]  ;;  %v830_v25 = vld [vmem:[%s2113_s5 + $0x138] sm:$0xff] }
  0xbd   : > { %v453_v39 = vpop.permute.xlu2 %452  ;;  %933 = vmatpush.msrb.mxu2 %v840_v24  ;;  %1066 = vmatpush.msrb.mxu0 %v830_v25  ;;  %v833_v24 = vld [vmem:[%s2113_s5 + $0x150] sm:$0xff] }
  0xbe   : > { %v602_v28 = vadd.f32 %v586_v2, %v505_v26  ;;  %v492_v57 = vmul.f32 %v1675_v33, %v453_v39  ;;  %v827_v2 = vld [vmem:[%s2113_s5 + $0x120] sm:$0xff]  ;;  %v836_v26 = vld [vmem:[%s2113_s5 + $0x168] sm:$0xff] }
  0xbf   : > { %871 = vmatpush.msrb.mxu1 %v827_v2  ;;  %934 = vmatpush.msrb.mxu2 %v836_v26  ;;  %v815_v39 = vld [vmem:[%s2113_s5 + $0xc0] sm:$0xff] }
  0xc0   : > { %v622_v30 = vadd.f32 %v1691_v44, %v602_v28  ;;  %v493_v28 = vmul.f32 %v1675_v33, %v457_v22 }
  0xc1   : > { %v445_v32 = vpop.permute.xlu1 %444 }
  0xc2   : > { %v490_v35 = vmul.f32 %v1675_v33, %v445_v32  ;;  %v638_v36 = vmax.f32 %v622_v30, 0.0  ;;  %v826_v30 = vld [vmem:[%s2113_s5 + $0x118] sm:$0xff]  ;;  %v832_v32 = vld [vmem:[%s2113_s5 + $0x148] sm:$0xff] }
  0xc3   : > { %1067 = vmatpush.msrb.mxu0 %v826_v30  ;;  %935 = vmatpush.msrb.mxu2 %v832_v32  ;;  %v825_v30 = vld [vmem:[%s2113_s5 + $0x110] sm:$0xff] }
  0xc4   : > { %v506_v38 = vadd.f32 %v490_v35, %v409_v29  ;;  %1341 = vmatmul.msk.f32.vlgmr.msra.gmra.mxu1 %vm661_vm0, %v638_v36  ;;  %v823_v29 = vld [vmem:[%s2113_s5 + $0x100] sm:$0xff] }
  0xc5   : > { %872 = vmatpush.msrb.mxu1 %v823_v29  ;;  %v819_v36 = vld [vmem:[%s2113_s5 + $0xe0] sm:$0xff] }
  0xc6   : > { %v603_v40 = vadd.f32 %v587_v37, %v506_v38  ;;  %v370_v50 = vpop.permute.xlu2 %369  ;;  %v822_v37 = vld [vmem:[%s2113_s5 + $0xf8] sm:$0xff]  ;;  %v828_v38 = vld [vmem:[%s2113_s5 + $0x128] sm:$0xff] }
  0xc7   : > { %v412_v27 = vmul.f32 %v1671_v31, %v370_v50  ;;  %873 = vmatpush.msrb.mxu1 %v819_v36  ;;  %1068 = vmatpush.msrb.mxu0 %v822_v37  ;;  %v814_v50 = vld [vmem:[%s2113_s5 + $0xb8] sm:$0xff]  ;;  %v821_v36 = vld [vmem:[%s2113_s5 + $0xf0] sm:$0xff] }
  0xc8   : > { %v623_v41 = vadd.f32 %v1691_v44, %v603_v40  ;;  %936 = vmatpush.msrb.mxu2 %v828_v38  ;;  %v817_v38 = vld [vmem:[%s2113_s5 + $0xd0] sm:$0xff] }
  0xc9   : > { %874 = vmatpush.msrb.mxu1 %v815_v39  ;;  %1069 = vmatpush.msrb.mxu0 %v818_v42  ;;  %v809_v42 = vld [vmem:[%s2113_s5 + $0x90] sm:$0xff] }
  0xca   : > { %v360_v45 = vpop.permute.xlu1 %359  ;;  %v639_v46 = vmax.f32 %v623_v41, 0.0 }
  0xcb   : > { %v410_v47 = vmul.f32 %v1671_v31, %v360_v45  ;;  %v509_v45 = vadd.f32 %v493_v28, %v412_v27  ;;  %1070 = vmatpush.msrb.mxu0 %v814_v50  ;;  %v829_v28 = vld [vmem:[%s2113_s5 + $0x130] sm:$0xff] }
  0xcc   : > { %1342 = vmatmul.msk.f32.gmra.mxu1 %vm661_vm0, %v639_v46 }
  0xcd   : > { %v507_v49 = vadd.f32 %v491_v43, %v410_v47  ;;  %v824_v43 = vld [vmem:[%s2113_s5 + $0x108] sm:$0xff] }
  0xce   : > { %937 = vmatpush.msrb.mxu2 %v824_v43 }
  0xcf   : > { %v604_v51 = vadd.f32 %v588_v48, %v507_v49  ;;  %v461_v56 = vpop.permute.xlu2 %460  ;;  %v811_v49 = vld [vmem:[%s2113_s5 + $0xa0] sm:$0xff] }
  0xd0   : > { %v494_v12 = vmul.f32 %v1675_v33, %v461_v56  ;;  %875 = vmatpush.msrb.mxu1 %v811_v49  ;;  %v816_v56 = vld [vmem:[%s2113_s5 + $0xc8] sm:$0xff] }
  0xd1   : > { %v624_v52 = vadd.f32 %v1691_v44, %v604_v51  ;;  %v820_v51 = vld [vmem:[%s2113_s5 + $0xe8] sm:$0xff] }
  0xd2   : > { %v365_v53 = vpop.permute.xlu1 %364  ;;  %938 = vmatpush.msrb.mxu2 %v820_v51 }
  0xd3   : > { %v640_v54 = vmax.f32 %v624_v52, 0.0  ;;  %v411_v55 = vmul.f32 %v1671_v31, %v365_v53  ;;  %v380_v53 = vpop.permute.xlu0 %379 }
  0xd4   : > { %939 = vmatpush.msrb.mxu2 %v816_v56  ;;  %v1956_v56 = vld [vmem:[%s2112_s4] ss:$0 sm:$0xff] }
  0xd5   : > { %1343 = vmatmul.msk.f32.gmra.mxu1 %vm661_vm0, %v640_v54  ;;  %v508_v62 = vadd.f32 %v492_v57, %v411_v55  ;;  %v807_v54 = vld [vmem:[%s2113_s5 + $0x80] sm:$0xff]  ;;  %v810_v55 = vld [vmem:[%s2113_s5 + $0x98] sm:$0xff] }
  0xd6   : > { %876 = vmatpush.msrb.mxu1 %v807_v54  ;;  %v803_v57 = vld [vmem:[%s2113_s5 + $0x60] sm:$0xff]  ;;  %1071 = vmatpush.msrb.mxu0 %v810_v55  ;;  %v793_v54 = vld [vmem:[%s2113_s5 + $0x10] sm:$0xff] }
  0xd7   : > { %940 = vmatpush.msrb.mxu2 %v812_v61 }
  0xd8   : > { %v558_v1 = vpop.permute.xlu2 %557  ;;  %877 = vmatpush.msrb.mxu1 %v803_v57  ;;  %1072 = vmatpush.msrb.mxu0 %v806_v60 }
  0xd9   : > { %v591_v19 = vmul.f32 %v1677_v34, %v558_v1  ;;  %v798_v1 = vld [vmem:[%s2113_s5 + $0x38] sm:$0xff]  ;;  %941 = vmatpush.msrb.mxu2 %v808_v7 }
  0xda   : > { %878 = vmatpush.msrb.mxu1 %v799_v3 }
  0xdb   : > { %v550_v58 = vpop.permute.xlu1 %549  ;;  %942 = vmatpush.msrb.mxu2 %v804_v13  ;;  %v566_v22 = vpop.permute.xlu0 %565 }
  0xdc   : > { %v589_v63 = vmul.f32 %v1677_v34, %v550_v58  ;;  %v853_v58 = vld [vmem:[%s2113_s5 + $0x1f0] sm:$0xff]  ;;  %879 = vmatpush.msrb.mxu1 %v795_v8  ;;  %v593_v27 = vmul.f32 %v1677_v34, %v566_v22 }
  0xdd   : > { %995 = vmatpush.msrb.mxu3 %v853_v58 }
  0xde   : > { %v605_v4 = vadd.f32 %v589_v63, %v508_v62  ;;  %v414_v62 = vmul.f32 %v1671_v31, %v380_v53 }
  0xe0   : > { %v625_v5 = vadd.f32 %v1691_v44, %v605_v4  ;;  %v562_v47 = vpop.permute.xlu2 %561  ;;  %v849_v4 = vld [vmem:[%s2113_s5 + $0x1d0] sm:$0xff] }
  0xe1   : > { %996 = vmatpush.msrb.mxu3 %v849_v4  ;;  %v592_v10 = vmul.f32 %v1677_v34, %v562_v47 }
  0xe2   : > { %v641_v9 = vmax.f32 %v625_v5, 0.0  ;;  %v802_v5 = vld [vmem:[%s2113_s5 + $0x58] sm:$0xff] }
  0xe3   : > { %1073 = vmatpush.msrb.mxu0 %v802_v5  ;;  %v477_v53 = vpop.permute.xlu0 %476 }
  0xe4   : > { %v375_v14 = vpop.permute.xlu1 %374  ;;  %1344 = vmatmul.msk.f32.gmra.mxu1 %vm661_vm0, %v641_v9  ;;  %v845_v9 = vld [vmem:[%s2113_s5 + $0x1b0] sm:$0xff]  ;;  %v498_v58 = vmul.f32 %v1675_v33, %v477_v53 }
  0xe5   : > { %v413_v18 = vmul.f32 %v1671_v31, %v375_v14  ;;  %997 = vmatpush.msrb.mxu3 %v845_v9  ;;  %1074 = vmatpush.msrb.mxu0 %v798_v1  ;;  %v791_v14 = vld [vmem:[%s2113_s5] sm:$0xff] }
  0xe6   : > { %880 = vmatpush.msrb.mxu1 %v791_v14 }
  0xe7   : > { %v510_v23 = vadd.f32 %v494_v12, %v413_v18  ;;  %v800_v18 = vld [vmem:[%s2113_s5 + $0x48] sm:$0xff]  ;;  %998 = vmatpush.msrb.mxu3 %v841_v15  ;;  %1075 = vmatpush.msrb.mxu0 %v794_v16 }
  0xe8   : > { %943 = vmatpush.msrb.mxu2 %v800_v18 }
  0xe9   : > { %v607_v0 = vadd.f32 %v591_v19, %v510_v23  ;;  %v469_v12 = vpop.permute.xlu2 %468  ;;  %v837_v19 = vld [vmem:[%s2113_s5 + $0x170] sm:$0xff] }
  0xea   : > { %v496_v23 = vmul.f32 %v1675_v33, %v469_v12  ;;  %999 = vmatpush.msrb.mxu3 %v837_v19  ;;  %944 = vmatpush.msrb.mxu2 %v796_v20 }
  0xeb   : > { %v627_v35 = vadd.f32 %v1691_v44, %v607_v0  ;;  %v792_v0 = vld [vmem:[%s2113_s5 + $0x8] sm:$0xff] }
  0xec   : > { %1000 = vmatpush.msrb.mxu3 %v833_v24  ;;  %945 = vmatpush.msrb.mxu2 %v792_v0 }
  0xed   : > { %v554_v40 = vpop.permute.xlu1 %553  ;;  %v643_v41 = vmax.f32 %v627_v35, 0.0 }
  0xee   : > { %v590_v46 = vmul.f32 %v1677_v34, %v554_v40  ;;  %1001 = vmatpush.msrb.mxu3 %v829_v28 }
  0xef   : > { %1346 = vmatmul.msk.f32.vlgmr.msra.gmra.mxu2 %vm661_vm0, %v643_v41  ;;  %v813_v41 = vld [vmem:[%s2113_s5 + $0xb0] sm:$0xff] }
  0xf0   : > { %v606_v48 = vadd.f32 %v590_v46, %v509_v45  ;;  %1002 = vmatpush.msrb.mxu3 %v825_v30  ;;  %v805_v46 = vld [vmem:[%s2113_s5 + $0x70] sm:$0xff] }
  0xf1   : > { %v473_v32 = vpop.permute.xlu2 %472 }
  0xf2   : > { %v626_v52 = vadd.f32 %v1691_v44, %v606_v48  ;;  %1003 = vmatpush.msrb.mxu3 %v821_v36  ;;  %v497_v47 = vmul.f32 %v1675_v33, %v473_v32  ;;  %v801_v48 = vld [vmem:[%s2113_s5 + $0x50] sm:$0xff] }
  0xf4   : > { %v642_v59 = vmax.f32 %v626_v52, 0.0  ;;  %1004 = vmatpush.msrb.mxu3 %v817_v38  ;;  %v797_v52 = vld [vmem:[%s2113_s5 + $0x30] sm:$0xff] }
  0xf6   : > { %v465_v63 = vpop.permute.xlu1 %464  ;;  %1345 = vmatmul.msk.f32.gmra.mxu1 %vm661_vm0, %v642_v59  ;;  %1005 = vmatpush.msrb.mxu3 %v813_v41 }
  0xf7   : > { %v495_v6 = vmul.f32 %v1675_v33, %v465_v63 }
  0xf8   : > { %1006 = vmatpush.msrb.mxu3 %v809_v42 }
  0xf9   : > { %v511_v11 = vadd.f32 %v495_v6, %v414_v62 }
  0xfa   : > { %v395_v45 = vpop.permute.xlu2 %394  ;;  %1007 = vmatpush.msrb.mxu3 %v805_v46 }
  0xfb   : > { %v608_v17 = vadd.f32 %v592_v10, %v511_v11  ;;  %v417_v57 = vmul.f32 %v1671_v31, %v395_v45 }
  0xfc   : > { %1008 = vmatpush.msrb.mxu3 %v801_v48 }
  0xfd   : > { %v628_v21 = vadd.f32 %v1691_v44, %v608_v17  ;;  %v514_v4 = vadd.f32 %v498_v58, %v417_v57 }
  0xfe   : > { %1009 = vmatpush.msrb.mxu3 %v797_v52 }
  0xff   : > { %v385_v2 = vpop.permute.xlu1 %384  ;;  %v644_v25 = vmax.f32 %v628_v21, 0.0 }
 0x100   : > { %v415_v26 = vmul.f32 %v1671_v31, %v385_v2  ;;  %1010 = vmatpush.msrb.mxu3 %v793_v54  ;;  %v855_v54 = vld [vmem:[%s2114_s6] sm:$0xf] }
 0x101   : > { %1347 = vmatmul.msk.f32.gmra.mxu2 %vm661_vm0, %v644_v25  ;;  %v1986_v57 = vperm.slane %v855_v54, 0 }
 0x102   : > { %v512_v29 = vadd.f32 %v496_v23, %v415_v26  ;;  %v400_v60 = vpop.permute.xlu2 %399 }
 0x103   : > { %v418_v13 = vmul.f32 %v1671_v31, %v400_v60 }
 0x104   : > { %v609_v35 = vadd.f32 %v593_v27, %v512_v29 }
 0x106   : > { %v629_v37 = vadd.f32 %v1691_v44, %v609_v35 }
 0x107   : > { %v390_v39 = vpop.permute.xlu1 %389 }
 0x108   : > { %v645_v40 = vmax.f32 %v629_v37, 0.0  ;;  %v416_v43 = vmul.f32 %v1671_v31, %v390_v39 }
 0x10a   : > { %1348 = vmatmul.msk.f32.gmra.mxu2 %vm661_vm0, %v645_v40  ;;  %v513_v50 = vadd.f32 %v497_v47, %v416_v43 }
 0x10b   : > { %v578_v10 = vpop.permute.xlu2 %577 }
 0x10c   : > { %v596_v16 = vmul.f32 %v1677_v34, %v578_v10 }
 0x110   : > { %v570_v49 = vpop.permute.xlu1 %569 }
 0x111   : > { %v594_v51 = vmul.f32 %v1677_v34, %v570_v49 }
 0x113   : > { %v610_v55 = vadd.f32 %v594_v51, %v513_v50 }
 0x115   : > { %v630_v59 = vadd.f32 %v1691_v44, %v610_v55 }
 0x117   : > { %v727_v61 = vpop.f32.mrf.mxu0  ;;  %v646_v62 = vmax.f32 %v630_v59, 0.0  ;;  %v1989_v59 = vperm.slane %v855_v54, 3 }
 0x118   : > { %v728_v63 = vadd.f32 %v1956_v56, %v727_v61  ;;  %v574_v3 = vpop.permute.xlu1 %573 }
 0x119   : > { %v595_v5 = vmul.f32 %v1677_v34, %v574_v3  ;;  %1349 = vmatmul.msk.f32.gmra.mxu2 %vm661_vm0, %v646_v62 }
 0x11a   : > { %v775_v6 = vmax.f32 %v728_v63, 0.0 }
 0x11b   : > { %v611_v7 = vadd.f32 %v595_v5, %v514_v4 }
 0x11c   : > { %881 = vmatmul.f32.vlgmr.msrb.gmra.mxu1 %v775_v6  ;;  %1076 = vmatmul.f32.vlgmr.msrb.gmra.mxu0 %v775_v6 }
 0x11d   : > { %v631_v8 = vadd.f32 %v1691_v44, %v611_v7 }
 0x11f   : > { %v730_v9 = vpop.f32.mrf.mxu0  ;;  %v647_v1 = vmax.f32 %v631_v8, 0.0 }
 0x120   : > { %v731_v11 = vadd.f32 %v1956_v56, %v730_v9 }
 0x121   : > { %v481_v12 = vpop.permute.xlu1 %480  ;;  %1350 = vmatmul.msk.f32.vlgmr.msra.gmra.mxu3 %vm661_vm0, %v647_v1  ;;  %946 = vmatmul.f32.vlgmr.msrb.gmra.mxu2 %v775_v6 }
 0x122   : > { %v776_v14 = vmax.f32 %v731_v11, 0.0  ;;  %v499_v15 = vmul.f32 %v1675_v33, %v481_v12  ;;  %v1996_v11 = vperm.slane %v855_v54, 1 }
 0x124   : > { %v515_v17 = vadd.f32 %v499_v15, %v418_v13  ;;  %884 = vmatmul.f32.gmra.mxu1 %v776_v14  ;;  %1079 = vmatmul.f32.gmra.mxu0 %v776_v14 }
 0x126   : > { %v612_v18 = vadd.f32 %v596_v16, %v515_v17 }
 0x127   : > { %v733_v19 = vpop.f32.mrf.mxu0 }
 0x128   : > { %v734_v20 = vadd.f32 %v1956_v56, %v733_v19  ;;  %v632_v21 = vadd.f32 %v1691_v44, %v612_v18 }
 0x129   : > { %949 = vmatmul.f32.gmra.mxu2 %v776_v14 }
 0x12a   : > { %v777_v22 = vmax.f32 %v734_v20, 0.0  ;;  %v648_v23 = vmax.f32 %v632_v21, 0.0 }
 0x12c   : > { %1351 = vmatmul.msk.f32.gmra.mxu3 %vm661_vm0, %v648_v23  ;;  %887 = vmatmul.f32.gmra.mxu1 %v777_v22 }
 0x12d   : > { %1082 = vmatmul.f32.gmra.mxu0 %v777_v22 }
 0x12f   : > { %v736_v31 = vpop.f32.mrf.mxu0 }
 0x130   : > { %v737_v33 = vadd.f32 %v1956_v56, %v736_v31 }
 0x131   : > { %952 = vmatmul.f32.gmra.mxu2 %v777_v22 }
 0x132   : > { %v778_v34 = vmax.f32 %v737_v33, 0.0 }
 0x134   : > { %890 = vmatmul.f32.gmra.mxu1 %v778_v34  ;;  %1011 = vmatmul.f32.vlgmr.msrb.gmra.mxu3 %v775_v6 }
 0x135   : > { %1085 = vmatmul.f32.gmra.mxu0 %v778_v34 }
 0x137   : > { %v739_v24 = vpop.f32.mrf.mxu0 }
 0x138   : > { %v740_v2 = vadd.f32 %v1956_v56, %v739_v24 }
 0x139   : > { %955 = vmatmul.f32.gmra.mxu2 %v778_v34 }
 0x13a   : > { %v779_v44 = vmax.f32 %v740_v2, 0.0 }
 0x13c   : > { %893 = vmatmul.f32.gmra.mxu1 %v779_v44  ;;  %1014 = vmatmul.f32.gmra.mxu3 %v776_v14 }
 0x13d   : > { %1088 = vmatmul.f32.gmra.mxu0 %v779_v44 }
 0x141   : > { %v742_v25 = vpop.f32.mrf.mxu1  ;;  %958 = vmatmul.f32.gmra.mxu2 %v779_v44 }
 0x142   : > { %v743_v0 = vadd.f32 %v1956_v56, %v742_v25 }
 0x144   : > { %v780_v26 = vmax.f32 %v743_v0, 0.0  ;;  %1017 = vmatmul.f32.gmra.mxu3 %v777_v22 }
 0x146   : > { %896 = vmatmul.f32.gmra.mxu1 %v780_v26  ;;  %1091 = vmatmul.f32.gmra.mxu0 %v780_v26 }
 0x149   : > { %v745_v27 = vpop.f32.mrf.mxu1  ;;  %961 = vmatmul.f32.gmra.mxu2 %v780_v26 }
 0x14a   : > { %v746_v28 = vadd.f32 %v1956_v56, %v745_v27 }
 0x14c   : > { %v781_v29 = vmax.f32 %v746_v28, 0.0  ;;  %1020 = vmatmul.f32.gmra.mxu3 %v778_v34 }
 0x14e   : > { %899 = vmatmul.f32.gmra.mxu1 %v781_v29  ;;  %1094 = vmatmul.f32.gmra.mxu0 %v781_v29 }
 0x151   : > { %964 = vmatmul.f32.gmra.mxu2 %v781_v29 }
 0x152   : > { %v748_v30 = vpop.f32.mrf.mxu1 }
 0x153   : > { %v749_v32 = vadd.f32 %v1956_v56, %v748_v30 }
 0x154   : > { %1023 = vmatmul.f32.gmra.mxu3 %v779_v44 }
 0x155   : > { %v782_v35 = vmax.f32 %v749_v32, 0.0 }
 0x157   : > { %902 = vmatmul.f32.gmra.mxu1 %v782_v35  ;;  %1097 = vmatmul.f32.gmra.mxu0 %v782_v35 }
 0x159   : > { %967 = vmatmul.f32.gmra.mxu2 %v782_v35 }
 0x15c   : > { %1026 = vmatmul.f32.gmra.mxu3 %v780_v26 }
 0x161   : > { %v751_v36 = vpop.f32.mrf.mxu1 }
 0x162   : > { %v752_v37 = vadd.f32 %v1956_v56, %v751_v36 }
 0x164   : > { %v783_v38 = vmax.f32 %v752_v37, 0.0  ;;  %1029 = vmatmul.f32.gmra.mxu3 %v781_v29 }
 0x166   : > { %905 = vmatmul.f32.gmra.mxu1 %v783_v38  ;;  %970 = vmatmul.f32.gmra.mxu2 %v783_v38 }
 0x167   : > { %1100 = vmatmul.f32.gmra.mxu0 %v783_v38 }
 0x16c   : > { %1032 = vmatmul.f32.gmra.mxu3 %v782_v35  ;;  %v2008_v35 = vperm.slane %v855_v54, 2 }
 0x172   : > { %v757_v42 = vpop.f32.mrf.mxu2 }
 0x173   : > { %v754_v39 = vpop.f32.mrf.mxu1  ;;  %v758_v43 = vadd.f32 %v1956_v56, %v757_v42 }
 0x174   : > { %v755_v40 = vadd.f32 %v1956_v56, %v754_v39  ;;  %1035 = vmatmul.f32.gmra.mxu3 %v783_v38 }
 0x175   : > { %v785_v45 = vmax.f32 %v758_v43, 0.0 }
 0x176   : > { %v784_v41 = vmax.f32 %v755_v40, 0.0 }
 0x178   : > { %908 = vmatmul.f32.gmra.mxu1 %v784_v41  ;;  %973 = vmatmul.f32.gmra.mxu2 %v784_v41 }
 0x179   : > { %1103 = vmatmul.f32.gmra.mxu0 %v784_v41 }
 0x17c   : > { %1038 = vmatmul.f32.gmra.mxu3 %v784_v41 }
 0x180   : > { %911 = vmatmul.f32.gmra.mxu1 %v785_v45  ;;  %976 = vmatmul.f32.gmra.mxu2 %v785_v45 }
 0x181   : > { %1106 = vmatmul.f32.gmra.mxu0 %v785_v45 }
 0x184   : > { %v760_v46 = vpop.f32.mrf.mxu2  ;;  %1041 = vmatmul.f32.gmra.mxu3 %v785_v45 }
 0x185   : > { %v761_v47 = vadd.f32 %v1956_v56, %v760_v46 }
 0x187   : > { %v786_v48 = vmax.f32 %v761_v47, 0.0 }
 0x189   : > { %914 = vmatmul.f32.gmra.mxu1 %v786_v48  ;;  %979 = vmatmul.f32.gmra.mxu2 %v786_v48 }
 0x18a   : > { %1109 = vmatmul.f32.gmra.mxu0 %v786_v48 }
 0x18c   : > { %1044 = vmatmul.f32.gmra.mxu3 %v786_v48 }
 0x18d   : > { %v763_v49 = vpop.f32.mrf.mxu2 }
 0x18e   : > { %v764_v50 = vadd.f32 %v1956_v56, %v763_v49 }
 0x190   : > { %v787_v51 = vmax.f32 %v764_v50, 0.0 }
 0x192   : > { %917 = vmatmul.f32.gmra.mxu1 %v787_v51  ;;  %982 = vmatmul.f32.gmra.mxu2 %v787_v51 }
 0x193   : > { %1112 = vmatmul.f32.gmra.mxu0 %v787_v51 }
 0x194   : > { %1047 = vmatmul.f32.gmra.mxu3 %v787_v51 }
 0x199   : > { %v882_v52 = vpop.f32.mrf.mxu1  ;;  %v1077_v53 = vpop.f32.mrf.mxu0 }
 0x19a   : > { %v883_v61 = vadd.f32 %v882_v52, %v1986_v57  ;;  %v1078_v3 = vadd.f32 %v1077_v53, %v1989_v59 }
 0x19c   : > { %v766_v55 = vpop.f32.mrf.mxu2 }
 0x19d   : > { %v767_v58 = vadd.f32 %v1956_v56, %v766_v55 }
 0x19f   : > { %v788_v60 = vmax.f32 %v767_v58, 0.0 }
 0x1a1   : > { %v885_v62 = vpop.f32.mrf.mxu1  ;;  %920 = vmatmul.f32.gmra.mxu1 %v788_v60  ;;  %985 = vmatmul.f32.gmra.mxu2 %v788_v60  ;;  %v1080_v63 = vpop.f32.mrf.mxu0 }
 0x1a2   : > { %v886_v4 = vadd.f32 %v885_v62, %v1986_v57  ;;  %1050 = vmatmul.f32.gmra.mxu3 %v788_v60  ;;  %v1081_v5 = vadd.f32 %v1080_v63, %v1989_v59  ;;  %1115 = vmatmul.f32.gmra.mxu0 %v788_v60 }
 0x1a4   : > { %v1125_v6 = vmax.f32 %v883_v61, %v886_v4  ;;  %v1188_v7 = vmax.f32 %v1078_v3, %v1081_v5  ;;  %v769_v8 = vpop.f32.mrf.mxu3  ;;  %v947_v9 = vpop.f32.mrf.mxu2 }
 0x1a5   : > { %v770_v1 = vadd.f32 %v1956_v56, %v769_v8  ;;  %v948_v18 = vadd.f32 %v947_v9, %v1996_v11 }
 0x1a7   : > { %v789_v10 = vmax.f32 %v770_v1, 0.0 }
 0x1a9   : > { %v888_v12 = vpop.f32.mrf.mxu1  ;;  %923 = vmatmul.f32.gmra.mxu1 %v789_v10  ;;  %988 = vmatmul.f32.gmra.mxu2 %v789_v10 }
 0x1aa   : > { %v889_v13 = vadd.f32 %v888_v12, %v1986_v57  ;;  %1053 = vmatmul.f32.gmra.mxu3 %v789_v10  ;;  %v1083_v14 = vpop.f32.mrf.mxu0  ;;  %1118 = vmatmul.f32.gmra.mxu0 %v789_v10 }
 0x1ab   : > { %v1084_v15 = vadd.f32 %v1083_v14, %v1989_v59 }
 0x1ac   : > { %v1126_v16 = vmax.f32 %v1125_v6, %v889_v13  ;;  %v950_v17 = vpop.f32.mrf.mxu2 }
 0x1ad   : > { %v1189_v19 = vmax.f32 %v1188_v7, %v1084_v15  ;;  %v951_v20 = vadd.f32 %v950_v17, %v1996_v11 }
 0x1af   : > { %v1146_v21 = vmax.f32 %v948_v18, %v951_v20  ;;  %v772_v22 = vpop.f32.mrf.mxu3 }
 0x1b0   : > { %v773_v23 = vadd.f32 %v1956_v56, %v772_v22 }
 0x1b1   : > { %v891_v31 = vpop.f32.mrf.mxu1 }
 0x1b2   : > { %v790_v33 = vmax.f32 %v773_v23, 0.0  ;;  %v892_v34 = vadd.f32 %v891_v31, %v1986_v57  ;;  %v1086_v24 = vpop.f32.mrf.mxu0 }
 0x1b3   : > { %v1087_v2 = vadd.f32 %v1086_v24, %v1989_v59 }
 0x1b4   : > { %v1127_v44 = vmax.f32 %v1126_v16, %v892_v34  ;;  %926 = vmatmul.f32.gmra.mxu1 %v790_v33  ;;  %v953_v25 = vpop.f32.mrf.mxu2  ;;  %991 = vmatmul.f32.gmra.mxu2 %v790_v33 }
 0x1b5   : > { %v1190_v0 = vmax.f32 %v1189_v19, %v1087_v2  ;;  %v954_v26 = vadd.f32 %v953_v25, %v1996_v11  ;;  %1056 = vmatmul.f32.gmra.mxu3 %v790_v33  ;;  %1121 = vmatmul.f32.gmra.mxu0 %v790_v33 }
 0x1b7   : > { %v1147_v27 = vmax.f32 %v1146_v21, %v954_v26  ;;  %v1012_v28 = vpop.f32.mrf.mxu3 }
 0x1b8   : > { %v1013_v42 = vadd.f32 %v1012_v28, %v2008_v35 }
 0x1b9   : > { %v894_v29 = vpop.f32.mrf.mxu1 }
 0x1ba   : > { %v895_v56 = vadd.f32 %v894_v29, %v1986_v57  ;;  %v1089_v30 = vpop.f32.mrf.mxu0 }
 0x1bb   : > { %v1090_v32 = vadd.f32 %v1089_v30, %v1989_v59 }
 0x1bc   : > { %v2010_v36 = vmax.f32 %v1127_v44, %v895_v56  ;;  %v956_v37 = vpop.f32.mrf.mxu2 }
 0x1bd   : > { %v2012_v38 = vmax.f32 %v1190_v0, %v1090_v32  ;;  %v957_v39 = vadd.f32 %v956_v37, %v1996_v11 }
 0x1bf   : > { %v1148_v40 = vmax.f32 %v1147_v27, %v957_v39  ;;  %v1015_v41 = vpop.f32.mrf.mxu3 }
 0x1c0   : > { %v1016_v43 = vadd.f32 %v1015_v41, %v2008_v35 }
 0x1c2   : > { %v1167_v45 = vmax.f32 %v1013_v42, %v1016_v43 }
 0x1c3   : > { %v897_v55 = vpop.f32.mrf.mxu1  ;;  %v1092_v58 = vpop.f32.mrf.mxu0 }
 0x1c4   : > { %v959_v46 = vpop.f32.mrf.mxu2  ;;  %v898_v25 = vadd.f32 %v897_v55, %v1986_v57  ;;  %v1093_v0 = vadd.f32 %v1092_v58, %v1989_v59 }
 0x1c5   : > { %v960_v47 = vadd.f32 %v959_v46, %v1996_v11 }
 0x1c6   : > { %v1129_v30 = vmax.f32 %v2010_v36, %v898_v25  ;;  %v1192_v39 = vmax.f32 %v2012_v38, %v1093_v0 }
 0x1c7   : > { %v2018_v48 = vmax.f32 %v1148_v40, %v960_v47  ;;  %v1018_v49 = vpop.f32.mrf.mxu3 }
 0x1c8   : > { %v1019_v50 = vadd.f32 %v1018_v49, %v2008_v35 }
 0x1ca   : > { %v1168_v51 = vmax.f32 %v1167_v45, %v1019_v50 }
 0x1cb   : > { %v900_v3 = vpop.f32.mrf.mxu1  ;;  %v1095_v5 = vpop.f32.mrf.mxu0 }
 0x1cc   : > { %v962_v63 = vpop.f32.mrf.mxu2  ;;  %v901_v27 = vadd.f32 %v900_v3, %v1986_v57  ;;  %v1096_v29 = vadd.f32 %v1095_v5, %v1989_v59 }
 0x1cd   : > { %v963_v42 = vadd.f32 %v962_v63, %v1996_v11 }
 0x1ce   : > { %v1130_v41 = vmax.f32 %v1129_v30, %v901_v27  ;;  %v1193_v45 = vmax.f32 %v1192_v39, %v1096_v29 }
 0x1cf   : > { %v1021_v52 = vpop.f32.mrf.mxu3 }
 0x1d0   : > { %v1022_v53 = vadd.f32 %v1021_v52, %v2008_v35 }
 0x1d2   : > { %v1169_v54 = vmax.f32 %v1168_v51, %v1022_v53 }
 0x1d4   : > { %v965_v6 = vpop.f32.mrf.mxu2  ;;  %v903_v8 = vpop.f32.mrf.mxu1 }
 0x1d5   : > { %v1098_v9 = vpop.f32.mrf.mxu0  ;;  %v904_v32 = vadd.f32 %v903_v8, %v1986_v57  ;;  %v966_v36 = vadd.f32 %v965_v6, %v1996_v11 }
 0x1d6   : > { %v1099_v40 = vadd.f32 %v1098_v9, %v1989_v59 }
 0x1d7   : > { %v1024_v60 = vpop.f32.mrf.mxu3  ;;  %v1131_v49 = vmax.f32 %v1130_v41, %v904_v32 }
 0x1d8   : > { %v1025_v61 = vadd.f32 %v1024_v60, %v2008_v35  ;;  %v1194_v51 = vmax.f32 %v1193_v45, %v1099_v40 }
 0x1da   : > { %v2023_v62 = vmax.f32 %v1169_v54, %v1025_v61  ;;  %v1150_v54 = vmax.f32 %v2018_v48, %v963_v42 }
 0x1dc   : > { %v968_v1 = vpop.f32.mrf.mxu2  ;;  %v1151_v6 = vmax.f32 %v1150_v54, %v966_v36 }
 0x1dd   : > { %v969_v55 = vadd.f32 %v968_v1, %v1996_v11 }
 0x1df   : > { %v1027_v4 = vpop.f32.mrf.mxu3 }
 0x1e0   : > { %v1028_v46 = vadd.f32 %v1027_v4, %v2008_v35 }
 0x1e2   : > { %v1171_v63 = vmax.f32 %v2023_v62, %v1028_v46 }
 0x1e3   : > { %v906_v12 = vpop.f32.mrf.mxu1 }
 0x1e4   : > { %v1101_v13 = vpop.f32.mrf.mxu0  ;;  %v907_v43 = vadd.f32 %v906_v12, %v1986_v57 }
 0x1e5   : > { %v1102_v47 = vadd.f32 %v1101_v13, %v1989_v59 }
 0x1e6   : > { %v1132_v58 = vmax.f32 %v1131_v49, %v907_v43 }
 0x1e7   : > { %v1030_v7 = vpop.f32.mrf.mxu3  ;;  %v1195_v3 = vmax.f32 %v1194_v51, %v1102_v47 }
 0x1e8   : > { %v1031_v38 = vadd.f32 %v1030_v7, %v2008_v35 }
 0x1e9   : > { %v971_v14 = vpop.f32.mrf.mxu2 }
 0x1ea   : > { %v972_v7 = vadd.f32 %v971_v14, %v1996_v11  ;;  %v1172_v48 = vmax.f32 %v1171_v63, %v1031_v38 }
 0x1ef   : > { %v1033_v10 = vpop.f32.mrf.mxu3 }
 0x1f0   : > { %v1034_v4 = vadd.f32 %v1033_v10, %v2008_v35 }
 0x1f2   : > { %v1173_v25 = vmax.f32 %v1172_v48, %v1034_v4 }
 0x1f5   : > { %v909_v16 = vpop.f32.mrf.mxu1 }
 0x1f6   : > { %v1104_v17 = vpop.f32.mrf.mxu0  ;;  %v910_v50 = vadd.f32 %v909_v16, %v1986_v57 }
 0x1f7   : > { %v1036_v15 = vpop.f32.mrf.mxu3  ;;  %v1105_v52 = vadd.f32 %v1104_v17, %v1989_v59  ;;  %v1152_v17 = vmax.f32 %v1151_v6, %v969_v55 }
 0x1f8   : > { %v1133_v8 = vmax.f32 %v1132_v58, %v910_v50  ;;  %v1037_v1 = vadd.f32 %v1036_v15, %v2008_v35 }
 0x1f9   : > { %v1196_v12 = vmax.f32 %v1195_v3, %v1105_v52  ;;  %v1153_v27 = vmax.f32 %v1152_v17, %v972_v7 }
 0x1fa   : > { %v1174_v30 = vmax.f32 %v1173_v25, %v1037_v1 }
 0x1fb   : > { %v974_v18 = vpop.f32.mrf.mxu2 }
 0x1fc   : > { %v975_v62 = vadd.f32 %v974_v18, %v1996_v11 }
 0x1fd   : > { %v912_v20 = vpop.f32.mrf.mxu1 }
 0x1fe   : > { %v1107_v21 = vpop.f32.mrf.mxu0  ;;  %v913_v60 = vadd.f32 %v912_v20, %v1986_v57  ;;  %v1154_v39 = vmax.f32 %v1153_v27, %v975_v62 }
 0x1ff   : > { %v1039_v19 = vpop.f32.mrf.mxu3  ;;  %v1108_v5 = vadd.f32 %v1107_v21, %v1989_v59 }
 0x200   : > { %v1134_v20 = vmax.f32 %v1133_v8, %v913_v60  ;;  %v1040_v14 = vadd.f32 %v1039_v19, %v2008_v35 }
 0x201   : > { %v1197_v0 = vmax.f32 %v1196_v12, %v1108_v5 }
 0x202   : > { %v1175_v41 = vmax.f32 %v1174_v30, %v1040_v14 }
 0x203   : > { %v977_v22 = vpop.f32.mrf.mxu2 }
 0x204   : > { %v978_v29 = vadd.f32 %v977_v22, %v1996_v11 }
 0x206   : > { %v915_v31 = vpop.f32.mrf.mxu1  ;;  %v1155_v45 = vmax.f32 %v1154_v39, %v978_v29 }
 0x207   : > { %v2025_v23 = vpop.f32.mrf.mxu3  ;;  %v1110_v33 = vpop.f32.mrf.mxu0  ;;  %v916_v9 = vadd.f32 %v915_v31, %v1986_v57 }
 0x208   : > { %v1111_v13 = vadd.f32 %v1110_v33, %v1989_v59  ;;  %v1043_v18 = vadd.f32 %v2025_v23, %v2008_v35 }
 0x209   : > { %v1135_v15 = vmax.f32 %v1134_v20, %v916_v9 }
 0x20a   : > { %v1198_v32 = vmax.f32 %v1197_v0, %v1111_v13  ;;  %v1176_v47 = vmax.f32 %v1175_v41, %v1043_v18 }
 0x20c   : > { %v2027_v34 = vpop.f32.mrf.mxu2 }
 0x20d   : > { %v981_v40 = vadd.f32 %v2027_v34, %v1996_v11 }
 0x20f   : > { %v2029_v24 = vpop.f32.mrf.mxu3  ;;  %v918_v2 = vpop.f32.mrf.mxu1  ;;  %v1156_v50 = vmax.f32 %v1155_v45, %v981_v40 }
 0x210   : > { %v1113_v44 = vpop.f32.mrf.mxu0  ;;  %v919_v10 = vadd.f32 %v918_v2, %v1986_v57  ;;  %v1046_v22 = vadd.f32 %v2029_v24, %v2008_v35 }
 0x211   : > { %v1114_v31 = vadd.f32 %v1113_v44, %v1989_v59 }
 0x212   : > { %v1136_v19 = vmax.f32 %v1135_v15, %v919_v10  ;;  %v1177_v54 = vmax.f32 %v1176_v47, %v1046_v22 }
 0x213   : > { %v1199_v42 = vmax.f32 %v1198_v32, %v1114_v31 }
 0x215   : > { %v2033_v26 = vpop.f32.mrf.mxu2 }
 0x216   : > { %v984_v23 = vadd.f32 %v2033_v26, %v1996_v11 }
 0x217   : > { %v2036_v28 = vpop.f32.mrf.mxu3 }
 0x218   : > { %v1049_v34 = vadd.f32 %v2036_v28, %v2008_v35  ;;  %v1157_v60 = vmax.f32 %v1156_v50, %v984_v23 }
 0x21a   : > { %v1178_v28 = vmax.f32 %v1177_v54, %v1049_v34 }
 0x21e   : > { %v921_v56 = vpop.f32.mrf.mxu1 }
 0x21f   : > { %v1116_v37 = vpop.f32.mrf.mxu0  ;;  %v922_v33 = vadd.f32 %v921_v56, %v1986_v57 }
 0x220   : > { %v1117_v2 = vadd.f32 %v1116_v37, %v1989_v59 }
 0x221   : > { %v1137_v37 = vmax.f32 %v1136_v19, %v922_v33 }
 0x222   : > { %v1200_v49 = vmax.f32 %v1199_v42, %v1117_v2 }
 0x224   : > { %v986_v53 = vpop.f32.mrf.mxu2 }
 0x225   : > { %v1051_v61 = vpop.f32.mrf.mxu3  ;;  %v987_v51 = vadd.f32 %v986_v53, %v1996_v11 }
 0x226   : > { %v924_v16 = vpop.f32.mrf.mxu1  ;;  %v1052_v55 = vadd.f32 %v1051_v61, %v2008_v35 }
 0x227   : > { %v1119_v21 = vpop.f32.mrf.mxu0  ;;  %v925_v44 = vadd.f32 %v924_v16, %v1986_v57  ;;  %v1158_v6 = vmax.f32 %v1157_v60, %v987_v51 }
 0x228   : > { %v1120_v56 = vadd.f32 %v1119_v21, %v1989_v59  ;;  %v1179_v7 = vmax.f32 %v1178_v28, %v1052_v55 }
 0x229   : > { %v1138_v24 = vmax.f32 %v1137_v37, %v925_v44 }
 0x22a   : > { %v1201_v58 = vmax.f32 %v1200_v49, %v1120_v56 }
 0x22c   : > { %v989_v43 = vpop.f32.mrf.mxu2 }
 0x22d   : > { %v1054_v46 = vpop.f32.mrf.mxu3  ;;  %v990_v63 = vadd.f32 %v989_v43, %v1996_v11 }
 0x22e   : > { %v1055_v4 = vadd.f32 %v1054_v46, %v2008_v35 }
 0x22f   : > { %v1159_v9 = vmax.f32 %v1158_v6, %v990_v63 }
 0x230   : > { %v1180_v1 = vmax.f32 %v1179_v7, %v1055_v4 }
 0x231   : > { %v927_v36 = vpop.f32.mrf.mxu1 }
 0x232   : > { %v928_v38 = vadd.f32 %v927_v36, %v1986_v57  ;;  %v1122_v52 = vpop.f32.mrf.mxu0 }
 0x233   : > { %v1123_v26 = vadd.f32 %v1122_v52, %v1989_v59 }
 0x234   : > { %v1139_v3 = vmax.f32 %v1138_v24, %v928_v38 }
 0x235   : > { %v1202_v5 = vmax.f32 %v1201_v58, %v1123_v26 }
 0x236   : > { %v1140_v53 = vrot.slane %v1139_v3, 4 }
 0x237   : > { %v1203_v8 = vrot.slane %v1202_v5, 4  ;;  %v992_v57 = vpop.f32.mrf.mxu2 }
 0x238   : > { %v1141_v48 = vmax.f32 %v1139_v3, %v1140_v53  ;;  %v993_v61 = vadd.f32 %v992_v57, %v1996_v11  ;;  %v1057_v12 = vpop.f32.mrf.mxu3 }
 0x239   : > { %v1204_v59 = vmax.f32 %v1202_v5, %v1203_v8  ;;  %v1058_v13 = vadd.f32 %v1057_v12, %v2008_v35 }
 0x23a   : > { %v1142_v16 = vrot.slane %v1141_v48, 2  ;;  %v1160_v17 = vmax.f32 %v1159_v9, %v993_v61 }
 0x23b   : > { %v1205_v62 = vrot.slane %v1204_v59, 2  ;;  %v1181_v20 = vmax.f32 %v1180_v1, %v1058_v13 }
 0x23c   : > { %v1143_v10 = vmax.f32 %v1141_v48, %v1142_v16  ;;  %v1161_v21 = vrot.slane %v1160_v17, 4 }
 0x23d   : > { %v1206_v25 = vmax.f32 %v1204_v59, %v1205_v62  ;;  %v1182_v0 = vrot.slane %v1181_v20, 4 }
 0x23e   : > { %v1144_v14 = vrot.slane %v1143_v10, 1  ;;  %v1162_v31 = vmax.f32 %v1160_v17, %v1161_v21 }
 0x23f   : > { %v1207_v27 = vrot.slane %v1206_v25, 1  ;;  %v1183_v29 = vmax.f32 %v1181_v20, %v1182_v0 }
 0x240   : > { %v1145_v15 = vmax.f32 %v1143_v10, %v1144_v14  ;;  %v1163_v33 = vrot.slane %v1162_v31, 2 }
 0x241   : > { %v1208_v11 = vmax.f32 %v1206_v25, %v1207_v27  ;;  %v1184_v30 = vrot.slane %v1183_v29, 2 }
 0x242   : > { %v1164_v32 = vmax.f32 %v1162_v31, %v1163_v33 }
 0x243   : > { %v1185_v18 = vmax.f32 %v1183_v29, %v1184_v30  ;;  %1212 = sbr.rel (%p1352_p7) target bundleno = 590 (0x24e), region = 52 }
 0x244   : > { %v1165_v2 = vrot.slane %v1164_v32, 1 }
 0x245   : > { %v1186_v35 = vrot.slane %v1185_v18, 1 }
 0x246   : > { %v1166_v39 = vmax.f32 %v1164_v32, %v1165_v2 }
 0x247   : > { %v1187_v40 = vmax.f32 %v1185_v18, %v1186_v35 }
 0x248   : > { %v1217_v19 = vrot.slane %v1166_v39, 7  ;;  %v1219_v41 = vrot.slane %v1208_v11, 5  ;;  %vm1220_vm1 = vcmask 1040384   ;;  %vm1222_vm2 = vcmask 1042434  }
 0x249   : > { %v1218_v44 = vrot.slane %v1187_v40, 6  ;;  %vm1224_vm3 = vcmask 1041408   ;;  %v1227_v22 = vlaneseq }
 0x24a   : > { %v1221_v42 = vsel %vm1220_vm1, %v1145_v15, %v1217_v19 }
 0x24b   : > { %v1223_v56 = vsel %vm1222_vm2, %v1218_v44, %v1219_v41  ;;  %vm1229_vm4 = vcmp.lt.s32.totalorder %v1227_v22, 512 }
 0x24c   : > { %v1225_v43 = vsel %vm1224_vm3, %v1221_v42, %v1223_v56 }
 0x24d   : > { %1231 = vst.msk [vmem:[%s1582_s14] sm:$0xf] %vm1229_vm4, %v1225_v43 }
 0x24e PF: > { %p1353_p8 = scmp.le.s32.totalorder %s1482_s24, 0 }
 0x250   : > { %1235 = sbr.rel (%p1353_p8) target bundleno = 604 (0x25c), region = 56 }
 0x255   : > { %v1241_v45 = vrot.slane %v1166_v39, 7  ;;  %v1242_v23 = vrot.slane %v1187_v40, 6  ;;  %v1243_v37 = vrot.slane %v1208_v11, 5  ;;  %vm1244_vm5 = vcmask 1040384   ;;  %v1236_v46 = vld [vmem:[%s1582_s14] sm:$0xf] }
 0x256   : > { %vm1246_vm6 = vcmask 1042434   ;;  %vm1248_vm7 = vcmask 1041408   ;;  %v1252_v47 = vlaneseq }
 0x257   : > { %v1245_v34 = vsel %vm1244_vm5, %v1145_v15, %v1241_v45  ;;  %v1247_v49 = vsel %vm1246_vm6, %v1242_v23, %v1243_v37 }
 0x258   : > { %v1249_v36 = vsel %vm1248_vm7, %v1245_v34, %v1247_v49  ;;  %vm1254_vm8 = vcmp.lt.s32.totalorder %v1252_v47, 512 }
 0x259   : > { %v1251_v50 = vmax.f32 %v1236_v46, %v1249_v36 }
 0x25b   : > { %1256 = vst.msk [vmem:[%s1582_s14] sm:$0xf] %vm1254_vm8, %v1251_v50 }
 0x25c PF: > { %s17_s28 = sadd.s32 1, %s1498_s28   ;;  %s2116_s24 = smov %s1490_s26 }
 0x25d   : > { %p14_p9 = scmp.ge.s32.totalorder %s17_s28, 6   ;;  %s2117_s25 = smov %s1494_s27 }
 0x25e   : > { %s2118_s26 = smov %s2121_s29  ;;  %s2119_s27 = smov %s2125_s30 }
 0x25f   :  { %16 = sbr.rel (!%p14_p9) target bundleno = 3 (0x3), region = 86 }

</bundles_post_ra>
